<compile_context>
chip_gen: v7x
topology: tpu7x:2x2x1
jax: 0.10.0
libtpu: 0.0.40
codegen_flags: <defaults>
</compile_context>

<pallas_src>
import functools

import jax
import jax.numpy as jnp
from jax.experimental import pallas as pl
from jax.experimental.pallas import tpu as pltpu


D_IN = 128       # hidden_1
D_HID = 256      # hidden_2
D_OUT = 10       # head size
D_OUT_PAD = 128  # lane-dense padded head size


def _round_up(x: int, m: int) -> int:
    return ((x + m - 1) // m) * m


def mlp_head_kernel(x_ref, w2_ref, b2_ref, w3_ref, b3_ref, o_ref):
    # x_ref:  (TB, 128)  bf16   batch tile (double-buffered)
    # w2_ref: (128, 256) bf16   VMEM-resident
    # b2_ref: (1, 256)   f32    VMEM-resident
    # w3_ref: (256, 128) bf16   zero-padded cols 10..127, VMEM-resident
    # b3_ref: (1, 128)   f32    zero-padded, VMEM-resident
    # o_ref:  (TB, 128)  f32
    # fc2: bf16 MXU, f32 accumulate; bias + ReLU in f32 on the VPU.
    h = jnp.dot(x_ref[...], w2_ref[...], preferred_element_type=jnp.float32)
    h = jnp.maximum(h + b2_ref[...], 0.0)
    # Dropout(p=0.2): eval-mode semantics -> identity.
    # TODO(synk): training-mode dropout (pltpu.prng_seed + scaled Bernoulli mask) not applied.
    # fc3: bf16 MXU, f32 accumulate; lane-dense 128-wide store.
    out = jnp.dot(h.astype(w3_ref.dtype), w3_ref[...],
                  preferred_element_type=jnp.float32)
    o_ref[...] = (out + b3_ref[...]).astype(o_ref.dtype)


@functools.partial(jax.jit, static_argnames=("tile_b",))
def mlp_head(x, w2, b2, w3, b3, *, tile_b: int = 512):
    """x: [B, 128] f32; w2: [128, 256]; b2: [256]; w3: [256, 10]; b3: [10] -> [B, 10] f32."""
    B = x.shape[0]

    # Tile size: multiple of 8 rows, at most tile_b; pad B up to a multiple of the tile.
    TB = min(tile_b, _round_up(max(B, 1), 8))
    TB = _round_up(TB, 8)
    B_pad = _round_up(B, TB)
    grid = (B_pad // TB,)

    # bf16 matmul operands; biases stay f32 (f32 VPU add/ReLU, fine on v5e).
    x_p = x.astype(jnp.bfloat16)
    if B_pad != B:
        x_p = jnp.pad(x_p, ((0, B_pad - B), (0, 0)))
    w2_b = w2.astype(jnp.bfloat16)
    b2_2d = b2.reshape(1, D_HID).astype(jnp.float32)
    # Pad W3 / b3 to 128 output lanes (zeros) for lane-dense output stores.
    w3_p = jnp.zeros((D_HID, D_OUT_PAD), jnp.bfloat16).at[:, :D_OUT].set(
        w3.astype(jnp.bfloat16))
    b3_p = jnp.zeros((1, D_OUT_PAD), jnp.float32).at[:, :D_OUT].set(
        b3.reshape(1, D_OUT).astype(jnp.float32))

    flops = 2 * B_pad * (D_IN * D_HID + D_HID * D_OUT_PAD)
    bytes_accessed = (
        B_pad * D_IN * 2              # x (bf16)
        + D_IN * D_HID * 2            # w2
        + D_HID * 4                   # b2
        + D_HID * D_OUT_PAD * 2       # w3 (padded)
        + D_OUT_PAD * 4               # b3
        + B_pad * D_OUT_PAD * 4       # out (f32)
    )

    out_pad = pl.pallas_call(
        mlp_head_kernel,
        out_shape=jax.ShapeDtypeStruct((B_pad, D_OUT_PAD), jnp.float32),
        grid=grid,
        in_specs=[
            pl.BlockSpec((TB, D_IN), lambda i: (i, 0)),           # x tile (double-buffered)
            pl.BlockSpec((D_IN, D_HID), lambda i: (0, 0)),        # w2 (resident)
            pl.BlockSpec((1, D_HID), lambda i: (0, 0)),           # b2 (resident)
            pl.BlockSpec((D_HID, D_OUT_PAD), lambda i: (0, 0)),   # w3 padded (resident)
            pl.BlockSpec((1, D_OUT_PAD), lambda i: (0, 0)),       # b3 padded (resident)
        ],
        out_specs=pl.BlockSpec((TB, D_OUT_PAD), lambda i: (i, 0)),
        compiler_params=pltpu.CompilerParams(
            dimension_semantics=("parallel",),       # shard batch tiles across TCs (v7x)
            vmem_limit_bytes=32 * 1024 * 1024,       # explicit, safe on v5e/v6e/v7x
        ),
        cost_estimate=pl.CostEstimate(
            flops=flops, transcendentals=0, bytes_accessed=bytes_accessed),
    )(x_p, w2_b, b2_2d, w3_p, b3_p)

    # Strip batch padding and the lane padding of the 10-wide head.
    return out_pad[:B, :D_OUT]


def init_params(key):
    """Deterministic init mimicking torch.nn.Linear default (U[-1/sqrt(fan_in), +1/sqrt(fan_in)])."""
    k1, k2, k3, k4 = jax.random.split(key, 4)
    bound2 = 1.0 / jnp.sqrt(D_IN)
    bound3 = 1.0 / jnp.sqrt(D_HID)
    # stored as [in, out] (transposed relative to torch's [out, in])
    w2 = jax.random.uniform(k1, (D_IN, D_HID), jnp.float32, -bound2, bound2)
    b2 = jax.random.uniform(k2, (D_HID,), jnp.float32, -bound2, bound2)
    w3 = jax.random.uniform(k3, (D_HID, D_OUT), jnp.float32, -bound3, bound3)
    b3 = jax.random.uniform(k4, (D_OUT,), jnp.float32, -bound3, bound3)
    return w2, b2, w3, b3


if __name__ == "__main__":
    key = jax.random.PRNGKey(0)
    kx, kp = jax.random.split(key)

    B = 8
    x = jax.random.normal(kx, (B, D_IN), jnp.float32)
    w2, b2, w3, b3 = init_params(kp)

    out = mlp_head(x, w2, b2, w3, b3)
    out = jax.block_until_ready(out)
    assert out.shape == (B, D_OUT)
    assert out.dtype == jnp.float32

    # Reference matching the kernel's numerics (bf16 operands, f32 accumulation).
    ref_h = jnp.maximum(
        jnp.dot(x.astype(jnp.bfloat16), w2.astype(jnp.bfloat16),
                preferred_element_type=jnp.float32) + b2, 0.0)
    ref_bf16 = jnp.dot(ref_h.astype(jnp.bfloat16), w3.astype(jnp.bfloat16),
                       preferred_element_type=jnp.float32) + b3
    assert jnp.allclose(out, ref_bf16, atol=1e-2, rtol=1e-2)

    # Sanity check against the pure-f32 math (looser tolerance for bf16 rounding).
    ref_f32 = jnp.maximum(x @ w2 + b2, 0.0) @ w3 + b3
    assert jnp.allclose(out, ref_f32, atol=5e-2, rtol=5e-2)

    print("KERNEL_OK")
</pallas_src>

<mosaic_0001>
module attributes {stable_mosaic.version = 11 : i64} {
  func.func @mlp_head_kernel(%arg0: i32, %arg1: memref<8x128xbf16, #tpu.memory_space<vmem>>, %arg2: memref<128x256xbf16, #tpu.memory_space<vmem>>, %arg3: memref<1x256xf32, #tpu.memory_space<vmem>>, %arg4: memref<256x128xbf16, #tpu.memory_space<vmem>>, %arg5: memref<1x128xf32, #tpu.memory_space<vmem>>, %arg6: memref<8x128xf32, #tpu.memory_space<vmem>>) attributes {dimension_semantics = [#tpu.dimension_semantics<parallel>], iteration_bounds = array<i64: 1>, scalar_prefetch = 0 : i64, scratch_operands = 0 : i64, tpu.core_type = #tpu.core_type<tc>, window_params = [{transform_indices = @transform_0, window_bounds = array<i64: 8, 128>}, {pipeline_mode = #tpu.pipeline_mode<synchronous>, transform_indices = @transform_1, window_bounds = array<i64: 128, 256>}, {pipeline_mode = #tpu.pipeline_mode<synchronous>, transform_indices = @transform_2, window_bounds = array<i64: 1, 256>}, {pipeline_mode = #tpu.pipeline_mode<synchronous>, transform_indices = @transform_3, window_bounds = array<i64: 256, 128>}, {pipeline_mode = #tpu.pipeline_mode<synchronous>, transform_indices = @transform_4, window_bounds = array<i64: 1, 128>}, {transform_indices = @transform_5, window_bounds = array<i64: 8, 128>}]} {
    %c0 = arith.constant 0 : index
    %c0_0 = arith.constant 0 : index
    %0 = vector.load %arg1[%c0, %c0_0] : memref<8x128xbf16, #tpu.memory_space<vmem>>, vector<8x128xbf16>
    %c0_1 = arith.constant 0 : index
    %c0_2 = arith.constant 0 : index
    %1 = vector.load %arg2[%c0_1, %c0_2] : memref<128x256xbf16, #tpu.memory_space<vmem>>, vector<128x256xbf16>
    %cst = arith.constant dense<0.000000e+00> : vector<8x256xf32>
    %2 = tpu.matmul %0, %1, %cst {dimension_numbers = #tpu.dot_dimension_numbers<[1], [0], [0], [1], [0, 0, 1, 1], [], []>} : vector<8x128xbf16>, vector<128x256xbf16>, vector<8x256xf32> -> vector<8x256xf32>
    %c0_3 = arith.constant 0 : index
    %c0_4 = arith.constant 0 : index
    %3 = vector.load %arg3[%c0_3, %c0_4] : memref<1x256xf32, #tpu.memory_space<vmem>>, vector<1x256xf32>
    %4 = vector.broadcast %3 : vector<1x256xf32> to vector<8x256xf32>
    %5 = arith.addf %2, %4 : vector<8x256xf32>
    %cst_5 = arith.constant 0.000000e+00 : f32
    %6 = vector.broadcast %cst_5 : f32 to vector<8x256xf32>
    %7 = arith.maximumf %5, %6 : vector<8x256xf32>
    %8 = arith.truncf %7 : vector<8x256xf32> to vector<8x256xbf16>
    %c0_6 = arith.constant 0 : index
    %c0_7 = arith.constant 0 : index
    %9 = vector.load %arg4[%c0_6, %c0_7] : memref<256x128xbf16, #tpu.memory_space<vmem>>, vector<256x128xbf16>
    %cst_8 = arith.constant dense<0.000000e+00> : vector<8x128xf32>
    %10 = tpu.matmul %8, %9, %cst_8 {dimension_numbers = #tpu.dot_dimension_numbers<[1], [0], [0], [1], [0, 0, 1, 1], [], []>} : vector<8x256xbf16>, vector<256x128xbf16>, vector<8x128xf32> -> vector<8x128xf32>
    %c0_9 = arith.constant 0 : index
    %c0_10 = arith.constant 0 : index
    %11 = vector.load %arg5[%c0_9, %c0_10] : memref<1x128xf32, #tpu.memory_space<vmem>>, vector<1x128xf32>
    %12 = vector.broadcast %11 : vector<1x128xf32> to vector<8x128xf32>
    %13 = arith.addf %10, %12 : vector<8x128xf32>
    %c0_11 = arith.constant 0 : index
    %c0_12 = arith.constant 0 : index
    %14 = vector.load %arg6[%c0_11, %c0_12] : memref<8x128xf32, #tpu.memory_space<vmem>>, vector<8x128xf32>
    tpu.vector_store %arg6[%c0_11, %c0_12], %13 {strides = array<i32>} : memref<8x128xf32, #tpu.memory_space<vmem>>, vector<8x128xf32>,
    return
  }
  func.func @transform_0(%arg0: i32) -> (i32, i32) {
    %c0_i32 = arith.constant 0 : i32
    %c0_i32_0 = arith.constant 0 : i32
    return %arg0, %c0_i32 : i32, i32
  }
  func.func @transform_1(%arg0: i32) -> (i32, i32) {
    %c0_i32 = arith.constant 0 : i32
    %c0_i32_0 = arith.constant 0 : i32
    %c0_i32_1 = arith.constant 0 : i32
    return %c0_i32, %c0_i32_0 : i32, i32
  }
  func.func @transform_2(%arg0: i32) -> (i32, i32) {
    %c0_i32 = arith.constant 0 : i32
    %c0_i32_0 = arith.constant 0 : i32
    %c0_i32_1 = arith.constant 0 : i32
    return %c0_i32, %c0_i32_0 : i32, i32
  }
  func.func @transform_3(%arg0: i32) -> (i32, i32) {
    %c0_i32 = arith.constant 0 : i32
    %c0_i32_0 = arith.constant 0 : i32
    %c0_i32_1 = arith.constant 0 : i32
    return %c0_i32, %c0_i32_0 : i32, i32
  }
  func.func @transform_4(%arg0: i32) -> (i32, i32) {
    %c0_i32 = arith.constant 0 : i32
    %c0_i32_0 = arith.constant 0 : i32
    %c0_i32_1 = arith.constant 0 : i32
    return %c0_i32, %c0_i32_0 : i32, i32
  }
  func.func @transform_5(%arg0: i32) -> (i32, i32) {
    %c0_i32 = arith.constant 0 : i32
    %c0_i32_0 = arith.constant 0 : i32
    return %arg0, %c0_i32 : i32, i32
  }
}

</mosaic_0001>

<bundles_post_ra>
// kernel: mlp_head.1
= control target key start
LH: loop header
LB: loop body
LE: loop exit
PB: predicated region body
PF: predicated region fallthrough
CT: control target
= control target key end

     0   :  { %v487_v2 = vmov 0   ;;  %s636_s0 = inlined_call_operand.vmem [shape: bf16[8,128], index: 0, kind: input, shape index: {}]   ;;  %s637_s1 = inlined_call_operand.vmem [shape: bf16[128,256], index: 1, kind: input, shape index: {}]   ;;  %s638_s2 = inlined_call_operand.vmem [shape: f32[1,256], index: 2, kind: input, shape index: {}]   ;;  %s639_s3 = inlined_call_operand.vmem [shape: bf16[256,128], index: 3, kind: input, shape index: {}]   ;;  %s640_s4 = inlined_call_operand.vmem [shape: f32[1,128], index: 4, kind: input, shape index: {}]   ;;  %s641_s5 = inlined_call_operand.hbm [shape: f32[8,128], index: 5, kind: output, shape index: {}]  }
   0x1   :  { %v423_v0 = vld [vmem:[%s637_s1 + $0x4] ss:$8 sps:$4 sm:$0xff]   ;;  %v425_v1 = vld [vmem:[%s637_s1] ss:$8 sps:$4 sm:$0xff]   ;;  %163 = vmatprep.mubr.bf16.mxu0 %v487_v2  ;;  %v426_v3 = vld [vmem:[%s637_s1 + $0x14] ss:$8 sps:$4 sm:$0xff]  }
   0x2   :  { %131 = vmatprep.subr.bf16.mxu0 %v423_v0  ;;  %v428_v4 = vld [vmem:[%s637_s1 + $0x10] ss:$8 sps:$4 sm:$0xff]   ;;  %v429_v5 = vld [vmem:[%s637_s1 + $0x24] ss:$8 sps:$4 sm:$0xff]   ;;  %v431_v6 = vld [vmem:[%s637_s1 + $0x20] ss:$8 sps:$4 sm:$0xff]  }
   0x3   :  { %132 = vmatpush1.bf16.msra.mxu0 %v425_v1  ;;  %v432_v7 = vld [vmem:[%s637_s1 + $0x34] ss:$8 sps:$4 sm:$0xff]   ;;  %v434_v8 = vld [vmem:[%s637_s1 + $0x30] ss:$8 sps:$4 sm:$0xff]   ;;  %v435_v9 = vld [vmem:[%s637_s1 + $0x44] ss:$8 sps:$4 sm:$0xff]  }
   0x4   :  { %133 = vmatprep.subr.bf16.mxu0 %v426_v3  ;;  %v447_v10 = vld [vmem:[%s639_s3 + $0x40] sm:$0xff]   ;;  %v449_v13 = vld [vmem:[%s639_s3 + $0x48] sm:$0xff]   ;;  %v451_v15 = vld [vmem:[%s639_s3 + $0x50] sm:$0xff]  }
   0x5   :  { %v448_v11 = vld [vmem:[%s639_s3] sm:$0xff]   ;;  %399 = vmatprep.subr.bf16.mxu1 %v447_v10  ;;  %v450_v14 = vld [vmem:[%s639_s3 + $0x8] sm:$0xff]   ;;  %v438_v16 = vld [vmem:[%s637_s1 + $0x54] ss:$8 sps:$4 sm:$0xff]  }
   0x6   :  { %v437_v12 = vld [vmem:[%s637_s1 + $0x40] ss:$8 sps:$4 sm:$0xff]   ;;  %400 = vmatpush3.bf16.msra.mxu1 %v448_v11  ;;  %v440_v17 = vld [vmem:[%s637_s1 + $0x50] ss:$8 sps:$4 sm:$0xff]   ;;  %v441_v20 = vld [vmem:[%s637_s1 + $0x64] ss:$8 sps:$4 sm:$0xff]  }
   0x7   :  { %134 = vmatpush1.bf16.msra.mxu0 %v428_v4  ;;  %401 = vmatprep.subr.bf16.mxu1 %v449_v13  ;;  %v452_v18 = vld [vmem:[%s639_s3 + $0x10] sm:$0xff]   ;;  %v453_v19 = vld [vmem:[%s639_s3 + $0x58] sm:$0xff]   ;;  %v443_v21 = vld [vmem:[%s637_s1 + $0x60] ss:$8 sps:$4 sm:$0xff]  }
   0x8   :  { %135 = vmatprep.subr.bf16.mxu0 %v429_v5  ;;  %v444_v22 = vld [vmem:[%s637_s1 + $0x74] ss:$8 sps:$4 sm:$0xff]   ;;  %v455_v24 = vld [vmem:[%s639_s3 + $0x60] sm:$0xff]  }
   0x9   :  { %v454_v23 = vld [vmem:[%s639_s3 + $0x18] sm:$0xff]   ;;  %v456_v25 = vld [vmem:[%s639_s3 + $0x20] sm:$0xff]  }
   0xa   :  { %402 = vmatpush3.bf16.msra.mxu1 %v450_v14 }
   0xb   :  { %136 = vmatpush1.bf16.msra.mxu0 %v431_v6  ;;  %403 = vmatprep.subr.bf16.mxu1 %v451_v15 }
   0xc   :  { %137 = vmatprep.subr.bf16.mxu0 %v432_v7 }
   0xe   :  { %404 = vmatpush3.bf16.msra.mxu1 %v452_v18 }
   0xf   :  { %138 = vmatpush1.bf16.msra.mxu0 %v434_v8  ;;  %405 = vmatprep.subr.bf16.mxu1 %v453_v19 }
  0x10   :  { %139 = vmatprep.subr.bf16.mxu0 %v435_v9 }
  0x12   :  { %406 = vmatpush3.bf16.msra.mxu1 %v454_v23 }
  0x13   :  { %140 = vmatpush1.bf16.msra.mxu0 %v437_v12 }
  0x14   :  { %141 = vmatprep.subr.bf16.mxu0 %v438_v16 }
  0x17   :  { %142 = vmatpush1.bf16.msra.mxu0 %v440_v17 }
  0x18   :  { %143 = vmatprep.subr.bf16.mxu0 %v441_v20 }
  0x19   :  { %10 = vsyncpa [#allocation3], 0  ;;  %v446_v26 = vld [vmem:[%s637_s1 + $0x70] ss:$8 sps:$4 sm:$0xff]   ;;  %407 = vmatprep.subr.bf16.mxu1 %v455_v24  ;;  %v457_v27 = vld [vmem:[%s639_s3 + $0x68] sm:$0xff]   ;;  %v41_v34 = vlaneseq }
  0x1a   :  { %408 = vmatpush3.bf16.msra.mxu1 %v456_v25  ;;  %v458_v28 = vld [vmem:[%s639_s3 + $0x28] sm:$0xff]   ;;  %v22_v29 = vld [vmem:[%s636_s0] sm:$0xf]  ;;  %v459_v30 = vld [vmem:[%s639_s3 + $0x70] sm:$0xff]  }
  0x1b   :  { %144 = vmatpush1.bf16.msra.mxu0 %v443_v21  ;;  %409 = vmatprep.subr.bf16.mxu1 %v457_v27  ;;  %v460_v31 = vld [vmem:[%s639_s3 + $0x30] sm:$0xff]   ;;  %v461_v32 = vld [vmem:[%s639_s3 + $0x78] sm:$0xff]   ;;  %v42_v35 = vshrl.u32 %v41_v34, 7  ;;  %v39_v37 = vld [vmem:[%s638_s2] sm:$0x3]  ;;  %s488_s2 = smov [#allocation2]  }
  0x1c   :  { %145 = vmatprep.subr.bf16.mxu0 %v444_v22  ;;  %v462_v33 = vld [vmem:[%s639_s3 + $0x38] sm:$0xff]   ;;  %v382_v53 = vld [vmem:[%s640_s4] ss:$0 sm:$0xff]  ;;  %s358_s10 = sshll.u32 %s488_s2, 4  ;;  %s359_s10 = int_to_ptr.vmem [resolvable:$true] %s358_s10 }
  0x1d   :  { %v43_v36 = vsub.s32 0, %v42_v35  ;;  %v47_v38 = vsub.s32 1, %v42_v35  ;;  %s463_s11 = scalar_lea.vmem %s359_s10, 128  ;;  %p468_p1 = scmp.lt.s32.totalorder %s359_s10, %s359_s10 }
  0x1e   :  { %410 = vmatpush3.bf16.msra.mxu1 %v458_v28  ;;  %p464_p0 = scmp.ne.s32.totalorder %s359_s10, %s463_s11  ;;  %p469_p2 = scmp.lt.s32.totalorder %s463_s11, %s463_s11 }
  0x1f   :  { %146 = vmatpush1.bf16.msra.mxu0 %v446_v26  ;;  %411 = vmatprep.subr.bf16.mxu1 %v459_v30  ;;  %v44_v39 = vrot.slane %v39_v37, %v43_v36  ;;  %v48_v40 = vrot.slane %v39_v37, %v47_v38 }
  0x20   :  { %p470_p3 = por %p469_p2, %p468_p1 }
  0x22   :  { %164 = vmatmul.mubr.bf16.vlgmr.msra.gmra.mrb[0].mxu0 %v22_v29  ;;  %412 = vmatpush3.bf16.msra.mxu1 %v460_v31  ;;  %p471_p4 = pnand %p470_p3, %p464_p0 }
  0x23   :  { %413 = vmatprep.subr.bf16.mxu1 %v461_v32 }
  0x26   :  { %414 = vmatpush3.bf16.msra.mxu1 %v462_v33 }
  0xf5   :  { %v165_v41 = vpop.f32.mrb[0].mxu0 }
  0xf6   :  { %v166_v42 = vadd.f32 %v165_v41, %v44_v39  ;;  %v167_v43 = vpop.f32.mrb[1].mxu0 }
  0xf7   :  { %v168_v44 = vadd.f32 %v167_v43, %v48_v40  ;;  %v169_v45 = vpop.f32.mrb[2].mxu0 }
  0xf8   :  { %v172_v46 = vmax.f32 %v166_v42, 0.0  ;;  %v170_v47 = vpop.f32.mrb[3].mxu0 }
  0xf9   :  { %v173_v48 = vmax.f32 %v168_v44, 0.0 }
  0xfa   :  { %v174_v50 = vpack.c.bf16 %v172_v46, %v172_v46 }
  0xfb   :  { %v175_v49 = vpack.c.bf16 %v173_v48, %v173_v48 }
  0xfd   :  { %343 = vmatprep.mubr.bf16.mxu1 %v175_v49 }
  0xfe   :  { %344 = vmatmul.mubr.bf16.vlgmr.msra.gmra.mrb[0].mxu1 %v174_v50 }
 0x1d1   :  { %v415_v51 = vpop.f32.mrb[0].mxu1 }
 0x1d2   :  { %v416_v52 = vpop.f32.mrb[1].mxu1 }
 0x1d3   :  { %v417_v54 = vadd.f32 %v416_v52, %v415_v51  ;;  %v418_v55 = vpop.f32.mrb[2].mxu1 }
 0x1d4   :  { %v419_v56 = vpop.f32.mrb[3].mxu1 }
 0x1d5   :  { %v346_v57 = vadd.f32 %v417_v54, %v382_v53 }
 0x1d7   :  { %351 = vst [vmem:[#allocation2] sm:$0xff] %v346_v57 }
 0x1d8   :  { %474 = shalt.err (!%p471_p4)
}
 0x1d9   :  { %s475_s14 = scalar_lea.hbm %s641_s5, 128 }
 0x1da   :  { %p476_p5 = scmp.ne.s32.totalorder %s641_s5, %s475_s14  ;;  %p479_p6 = scmp.lt.u32.totalorder %s475_s14, %s641_s5 }
 0x1dc   :  { %p481_p7 = pnand %p479_p6, %p476_p5 }
 0x1de   :  { %484 = shalt.err (!%p481_p7)
}
 0x1df   :  { %361 = dma.vmem_to_hbm [thread:$0]  %s359_s10, 128, %s641_s5, [#allocation3]  }
 0x1e0   :  { %485 = dma.done.wait [#allocation3], 128  }
 0x1e1   :  { %486 = vsyncadd [#allocation3], 4294967168 }
 0x1e2   :  { %365 = vsyncpa [#allocation3], 1 }

</bundles_post_ra>
